<compile_context>
chip_gen: v7x
topology: tpu7x:2x2x1
jax: 0.10.0
libtpu: 0.0.40
codegen_flags: <defaults>
</compile_context>

<pallas_src>
import math
import functools

import jax
import jax.numpy as jnp
from jax import lax
from jax.experimental import pallas as pl
from jax.experimental.pallas import tpu as pltpu


def _round_up(x, m):
    return (x + m - 1) // m * m


def _round_down(x, m):
    return x // m * m


# --------------------------- in-kernel helpers ---------------------------

def _pos_tile(p_block, batch, tokens):
    """(R, Dp) positional rows -> (T, Dp) per-token rows (row r repeated `batch`
    consecutive times).  Built as a small selection matmul (iota/compare/dot only)
    instead of a sublane-collapsing broadcast+reshape, which may not lower."""
    R, Dp = p_block.shape
    if batch == 1:
        return p_block.astype(jnp.float32)
    t_idx = lax.broadcasted_iota(jnp.int32, (tokens, R), 0)
    r_idx = lax.broadcasted_iota(jnp.int32, (tokens, R), 1)
    diff = t_idx - r_idx * batch                  # sel[t, r] == (t // batch == r)
    sel = jnp.logical_and(diff >= 0, diff < batch)
    return jnp.dot(sel.astype(p_block.dtype), p_block,
                   precision=jax.lax.Precision.HIGHEST,
                   preferred_element_type=jnp.float32)


# ------------------------------- kernels ---------------------------------

def _embed_onehot_kernel(idx_ref, w_ref, p_ref, o_ref, *, batch):
    """One grid step handles T tokens.

    idx_ref : VMEM (T, 1)  int32   per-tile token ids
    w_ref   : VMEM (Vp, Dp)        word table, pre-scaled by sqrt(D), resident
    p_ref   : VMEM (R, Dp)         positional rows for this tile (R = T // batch)
    o_ref   : VMEM (T, Dp)         lane-dense output tile
    """
    T, Dp = o_ref.shape
    Vp = w_ref.shape[0]
    ids = idx_ref[...]                                            # (T, 1)
    onehot = lax.broadcasted_iota(jnp.int32, (T, Vp), 1) == ids   # (T, Vp)
    word = jnp.dot(onehot.astype(w_ref.dtype), w_ref[...],        # MXU gather
                   precision=jax.lax.Precision.HIGHEST,
                   preferred_element_type=jnp.float32)            # (T, Dp)
    o_ref[...] = (word + _pos_tile(p_ref[...], batch, T)).astype(o_ref.dtype)


def _embed_gather_kernel(idx_ref, w_ref, p_ref, o_ref, *, batch, tile, vocab_pad):
    """Fallback for vocabularies too large for the one-hot matmul (table still
    VMEM-resident).  idx_ref is the scalar-prefetched full id vector (SMEM)."""
    Dp = o_ref.shape[1]
    base = pl.program_id(0) * tile

    def body(t, carry):
        tok = jnp.clip(idx_ref[base + t], 0, vocab_pad - 1)
        o_ref[pl.ds(t, 1), :] = w_ref[pl.ds(tok, 1), :].astype(o_ref.dtype)
        return carry

    lax.fori_loop(0, tile, body, 0, unroll=8)
    o_ref[...] = o_ref[...] + _pos_tile(p_ref[...], batch, tile).astype(o_ref.dtype)


# ---------------------------- parameter prep -----------------------------

def prepare_embedding_params(word_emb, pos_emb, *, table_dtype=jnp.float32):
    """One-time pad / cast / pre-scale of the tables (hoisted out of forward).

    Word table is pre-scaled by sqrt(emb_dim) so the kernel skips the per-tile mul.
    Use table_dtype=jnp.bfloat16 to halve the resident footprint for large vocabs."""
    V, D = word_emb.shape
    L, D2 = pos_emb.shape
    assert D2 == D
    Dp = _round_up(D, 128)                # lane-dense last dim
    Vp = _round_up(V, 128)                # clean contraction dim for the one-hot matmul
    Lp = _round_up(L, 8)
    scale = math.sqrt(D)
    w = jnp.zeros((Vp, Dp), table_dtype).at[:V, :D].set(
        (word_emb.astype(jnp.float32) * scale).astype(table_dtype))
    p = jnp.zeros((Lp, Dp), table_dtype).at[:L, :D].set(pos_emb.astype(table_dtype))
    return {"w": w, "p": p, "V": V, "L": L, "D": D}


# ------------------------------- wrapper ----------------------------------

def embedding_forward(x_idx, params, *, max_tile_tokens=1024,
                      onehot_max_vocab=1024, out_dtype=jnp.float32):
    """x_idx: (S, B) int token ids.  Returns (S, B, D) embeddings (sum of scaled word
    embedding and sinusoidal positional embedding), matching the torch module."""
    w_p, p_p = params["w"], params["p"]
    D, L = params["D"], params["L"]
    Vp, Dp = w_p.shape
    Lp = p_p.shape[0]
    S, B = x_idx.shape
    assert S <= L, "sequence length exceeds positional table (max_len)"
    N = S * B
    itm = jnp.dtype(w_p.dtype).itemsize

    # ---- tile selection: T tokens per grid step, multiple of 8*B so the tile's
    # positional rows are exactly R = T // B consecutive table rows (R % 8 == 0).
    unit = 8 * B
    T = min(_round_up(N, unit), max(_round_down(max_tile_tokens, unit), unit))

    # ---- VMEM budget from the actual chip (v7x: 64 MiB per TC); tables at 2x
    # (default double-buffering), plus per-tile blocks and in-kernel temporaries.
    try:
        cap = pltpu.get_tpu_info().vmem_capacity_bytes
    except Exception:  # pragma: no cover - conservative fallback
        cap = 64 << 20
    budget = cap - (8 << 20)

    def vmem_need(t):
        r = t // B
        table = 2 * Vp * Dp * itm
        blocks = 2 * (r * Dp * itm + t * Dp * 4 + t * 512)
        temps = (t * Vp * 4 + t * r * 4) if Vp <= onehot_max_vocab else 0
        return table + blocks + temps + (4 << 20)

    while T > unit and vmem_need(T) > budget:
        T = max(unit, _round_down(T // 2, unit))

    R = T // B
    N_pad = _round_up(N, T)
    num_tiles = N_pad // T

    # Positional rows must cover num_tiles*R rows; pad the (small) table only if the
    # padded tail tile reaches past it (those rows are discarded after the kernel).
    rows_needed = num_tiles * R
    p_use = p_p if rows_needed <= Lp else jnp.pad(p_p, ((0, rows_needed - Lp), (0, 0)))

    flat_idx = x_idx.reshape(N).astype(jnp.int32)
    if N_pad != N:
        flat_idx = jnp.pad(flat_idx, (0, N_pad - N))   # pad ids -> zero row of table

    vmem_limit = int(min(max(vmem_need(T), 32 << 20), max(budget, 32 << 20)))
    # On v7x, "parallel" shards the grid across 2 TensorCores, duplicating the resident
    # table DMA; only do that when the table is small.
    table_bytes = Vp * Dp * itm
    dims = ("parallel",) if table_bytes <= (8 << 20) else ("arbitrary",)
    cparams = pltpu.CompilerParams(dimension_semantics=dims,
                                   vmem_limit_bytes=vmem_limit)
    out_shape = jax.ShapeDtypeStruct((N_pad, Dp), out_dtype)

    if Vp <= onehot_max_vocab:
        # ---- one-hot MXU gather path (small / medium vocab) ----
        ids2d = flat_idx.reshape(N_pad, 1)
        grid_spec = pltpu.PrefetchScalarGridSpec(
            num_scalar_prefetch=0,
            grid=(num_tiles,),
            in_specs=[
                pl.BlockSpec((T, 1), lambda i: (i, 0)),        # per-tile token ids
                pl.BlockSpec((Vp, Dp), lambda i: (0, 0)),      # word table, resident
                pl.BlockSpec((R, Dp), lambda i: (i, 0)),       # pos rows for this tile
            ],
            out_specs=pl.BlockSpec((T, Dp), lambda i: (i, 0)),
        )
        out_flat = pl.pallas_call(
            functools.partial(_embed_onehot_kernel, batch=B),
            out_shape=out_shape, grid_spec=grid_spec, compiler_params=cparams,
        )(ids2d, w_p, p_use)
    else:
        # ---- row-gather fallback (larger vocab, table still VMEM-resident) ----
        # TODO(synk): for tables too large for VMEM residency, use a streamed manual-DMA
        # gather (memory_space=pl.ANY + pltpu.make_async_copy ring); for very long
        # sequences, block the ids through SMEM instead of whole-array scalar prefetch.
        grid_spec = pltpu.PrefetchScalarGridSpec(
            num_scalar_prefetch=1,
            grid=(num_tiles,),
            in_specs=[
                pl.BlockSpec((Vp, Dp), lambda i, idx: (0, 0)),
                pl.BlockSpec((R, Dp), lambda i, idx: (i, 0)),
            ],
            out_specs=pl.BlockSpec((T, Dp), lambda i, idx: (i, 0)),
        )
        out_flat = pl.pallas_call(
            functools.partial(_embed_gather_kernel, batch=B, tile=T, vocab_pad=Vp),
            out_shape=out_shape, grid_spec=grid_spec, compiler_params=cparams,
        )(flat_idx, w_p, p_use)

    out = out_flat
    if N_pad != N:
        out = out[:N]
    if Dp != D:
        out = out[:, :D]
    return out.reshape(S, B, D)


# ---------------------------- parameter setup ------------------------------

def make_word_emb(key, num_word, emb_dim, padding_idx):
    w = jax.random.normal(key, (num_word, emb_dim), dtype=jnp.float32)
    w = w.at[0].set(0.0)                 # emb_init zeroes row 0
    w = w.at[padding_idx].set(0.0)       # padding row (same as row 0 here)
    return w


def make_pos_emb(max_len, emb_dim):
    pe = jnp.zeros((max_len, emb_dim), dtype=jnp.float32)
    position = jnp.arange(0, max_len, dtype=jnp.float32)[:, None]
    div_term = jnp.exp(jnp.arange(0, emb_dim, 2, dtype=jnp.float32)
                       * -(math.log(10000.0) / emb_dim))
    pe = pe.at[:, 0::2].set(jnp.sin(position * div_term))
    pe = pe.at[:, 1::2].set(jnp.cos(position * div_term))
    return pe


# --------------------------------- main -------------------------------------

if __name__ == "__main__":
    num_word, max_len, emb_dim, padding_idx = 64, 16, 32, 0
    seq_len, batch = 8, 2

    key = jax.random.PRNGKey(0)
    k_w, k_x = jax.random.split(key)

    word_emb = make_word_emb(k_w, num_word, emb_dim, padding_idx)
    pos_emb = make_pos_emb(max_len, emb_dim)
    params = prepare_embedding_params(word_emb, pos_emb)   # one-time pad/cast/pre-scale

    x = jax.random.randint(k_x, (seq_len, batch), 0, num_word, dtype=jnp.int32)

    out = embedding_forward(x, params)
    out = jax.block_until_ready(out)

    # pure-JAX reference (dropout p=0 -> identity)
    ref = word_emb[x] * math.sqrt(emb_dim) + pos_emb[:seq_len][:, None, :]
    assert out.shape == (seq_len, batch, emb_dim)
    assert jnp.allclose(out, ref, atol=1e-5, rtol=1e-5), \
        float(jnp.max(jnp.abs(out - ref)))

    print("KERNEL_OK")
</pallas_src>

<mosaic_0001>
module attributes {stable_mosaic.version = 11 : i64} {
  func.func @_embed_onehot_kernel(%arg0: i32, %arg1: memref<16x1xi32, #tpu.memory_space<vmem>>, %arg2: memref<128x128xf32, #tpu.memory_space<vmem>>, %arg3: memref<8x128xf32, #tpu.memory_space<vmem>>, %arg4: memref<16x128xf32, #tpu.memory_space<vmem>>) attributes {dimension_semantics = [#tpu.dimension_semantics<parallel>], iteration_bounds = array<i64: 1>, scalar_prefetch = 0 : i64, scratch_operands = 0 : i64, tpu.core_type = #tpu.core_type<tc>, window_params = [{transform_indices = @transform_0, window_bounds = array<i64: 16, 1>}, {pipeline_mode = #tpu.pipeline_mode<synchronous>, transform_indices = @transform_1, window_bounds = array<i64: 128, 128>}, {transform_indices = @transform_2, window_bounds = array<i64: 8, 128>}, {transform_indices = @transform_3, window_bounds = array<i64: 16, 128>}]} {
    %c0 = arith.constant 0 : index
    %c0_0 = arith.constant 0 : index
    %0 = vector.load %arg1[%c0, %c0_0] : memref<16x1xi32, #tpu.memory_space<vmem>>, vector<16x1xi32>
    %1 = tpu.iota {dimensions = array<i32: 1>} : vector<16x128xi32>
    %2 = vector.broadcast %0 : vector<16x1xi32> to vector<16x128xi32>
    %3 = arith.cmpi eq, %1, %2 : vector<16x128xi32>
    %4 = arith.extui %3 : vector<16x128xi1> to vector<16x128xi32>
    %5 = arith.sitofp %4 : vector<16x128xi32> to vector<16x128xf32>
    %c0_1 = arith.constant 0 : index
    %c0_2 = arith.constant 0 : index
    %6 = vector.load %arg2[%c0_1, %c0_2] : memref<128x128xf32, #tpu.memory_space<vmem>>, vector<128x128xf32>
    %cst = arith.constant dense<0.000000e+00> : vector<16x128xf32>
    %7 = tpu.matmul %5, %6, %cst {dimension_numbers = #tpu.dot_dimension_numbers<[1], [0], [0], [1], [0, 0, 1, 1], [], []>, precision = #tpu.contract_precision<fp32>} : vector<16x128xf32>, vector<128x128xf32>, vector<16x128xf32> -> vector<16x128xf32>
    %c0_3 = arith.constant 0 : index
    %c0_4 = arith.constant 0 : index
    %8 = vector.load %arg3[%c0_3, %c0_4] : memref<8x128xf32, #tpu.memory_space<vmem>>, vector<8x128xf32>
    %9 = tpu.iota {dimensions = array<i32: 0>} : vector<16x8xi32>
    %10 = tpu.iota {dimensions = array<i32: 1>} : vector<16x8xi32>
    %c2_i32 = arith.constant 2 : i32
    %11 = vector.broadcast %c2_i32 : i32 to vector<16x8xi32>
    %12 = arith.muli %10, %11 : vector<16x8xi32>
    %13 = arith.subi %9, %12 : vector<16x8xi32>
    %c0_i32 = arith.constant 0 : i32
    %14 = vector.broadcast %c0_i32 : i32 to vector<16x8xi32>
    %15 = arith.cmpi sge, %13, %14 : vector<16x8xi32>
    %c2_i32_5 = arith.constant 2 : i32
    %16 = vector.broadcast %c2_i32_5 : i32 to vector<16x8xi32>
    %17 = arith.cmpi slt, %13, %16 : vector<16x8xi32>
    %18 = arith.andi %15, %17 : vector<16x8xi1>
    %19 = arith.extui %18 : vector<16x8xi1> to vector<16x8xi32>
    %20 = arith.sitofp %19 : vector<16x8xi32> to vector<16x8xf32>
    %cst_6 = arith.constant dense<0.000000e+00> : vector<16x128xf32>
    %21 = tpu.matmul %20, %8, %cst_6 {dimension_numbers = #tpu.dot_dimension_numbers<[1], [0], [0], [1], [0, 0, 1, 1], [], []>, precision = #tpu.contract_precision<fp32>} : vector<16x8xf32>, vector<8x128xf32>, vector<16x128xf32> -> vector<16x128xf32>
    %22 = arith.addf %7, %21 : vector<16x128xf32>
    %c0_7 = arith.constant 0 : index
    %c0_8 = arith.constant 0 : index
    %23 = vector.load %arg4[%c0_7, %c0_8] : memref<16x128xf32, #tpu.memory_space<vmem>>, vector<16x128xf32>
    tpu.vector_store %arg4[%c0_7, %c0_8], %22 {strides = array<i32>} : memref<16x128xf32, #tpu.memory_space<vmem>>, vector<16x128xf32>,
    return
  }
  func.func @transform_0(%arg0: i32) -> (i32, i32) {
    %c0_i32 = arith.constant 0 : i32
    %c0_i32_0 = arith.constant 0 : i32
    return %arg0, %c0_i32 : i32, i32
  }
  func.func @transform_1(%arg0: i32) -> (i32, i32) {
    %c0_i32 = arith.constant 0 : i32
    %c0_i32_0 = arith.constant 0 : i32
    %c0_i32_1 = arith.constant 0 : i32
    return %c0_i32, %c0_i32_0 : i32, i32
  }
  func.func @transform_2(%arg0: i32) -> (i32, i32) {
    %c0_i32 = arith.constant 0 : i32
    %c0_i32_0 = arith.constant 0 : i32
    return %arg0, %c0_i32 : i32, i32
  }
  func.func @transform_3(%arg0: i32) -> (i32, i32) {
    %c0_i32 = arith.constant 0 : i32
    %c0_i32_0 = arith.constant 0 : i32
    return %arg0, %c0_i32 : i32, i32
  }
}

</mosaic_0001>

<bundles_post_ra>
// kernel: tpu_custom_call.1
= control target key start
LH: loop header
LB: loop body
LE: loop exit
PB: predicated region body
PF: predicated region fallthrough
CT: control target
= control target key end

     0   :  { %8 = vsyncpa [#allocation3], 0  ;;  %s2407_s0 = inlined_call_operand.vmem [shape: s32[16,1], index: 0, kind: input, shape index: {}]   ;;  %s2408_s1 = inlined_call_operand.hbm [shape: f32[128,128], index: 1, kind: input, shape index: {}]   ;;  %s2409_s2 = inlined_call_operand.vmem [shape: f32[16,128], index: 2, kind: input, shape index: {}]   ;;  %s2410_s3 = inlined_call_operand.hbm [shape: f32[16,128], index: 3, kind: output, shape index: {}]  }
   0x1   :  { %9 = vsyncpa [#allocation4], 0  ;;  %s1929_s12 = smov [#allocation2]   ;;  %s1881_s16 = scalar_lea.hbm %s2408_s1, 2048 }
   0x2   :  { %s17_s13 = sshll.u32 %s1929_s12, 4  ;;  %p1882_p0 = scmp.ne.s32.totalorder %s2408_s1, %s1881_s16  ;;  %s18_s13 = int_to_ptr.vmem [resolvable:$true] %s17_s13 }
   0x3   :  { %p1885_p1 = scmp.lt.u32.totalorder %s1881_s16, %s2408_s1 }
   0x5   :  { %p1887_p2 = pnand %p1885_p1, %p1882_p0 }
   0x7   :  { %1890 = shalt.err (!%p1887_p2)
}
   0x8   :  { %s1891_s21 = scalar_lea.vmem %s18_s13, 2048  ;;  %p1896_p4 = scmp.lt.s32.totalorder %s18_s13, %s18_s13 }
   0x9   :  { %p1892_p3 = scmp.ne.s32.totalorder %s18_s13, %s1891_s21  ;;  %p1897_p5 = scmp.lt.s32.totalorder %s1891_s21, %s1891_s21 }
   0xb   :  { %p1898_p6 = por %p1897_p5, %p1896_p4 }
   0xd   :  { %p1899_p7 = pnand %p1898_p6, %p1892_p3 }
   0xf   :  { %1902 = shalt.err (!%p1899_p7)
}
  0x10   :  { %s1930_s22 = smov 128   ;;  %s1931_s23 = smov 8  }
  0x11   :  { %23 = dma.hbm_to_vmem [thread:$0]  %s2408_s1, 2048, %s18_s13, [#allocation3], %s1930_s22, %s1930_s22, %s1931_s23  }
  0x12   :  { %1925 = dma.done.wait [#allocation3], 2048  }
  0x13   :  { %1926 = vsyncadd [#allocation3], 4294965248  ;;  %v31_v0 = vlaneseq  ;;  %v1932_v1 = vmov 0   ;;  %v29_v8 = vld [vmem:[%s2407_s0] sm:$0xff]  ;;  %vm78_vm0 = vcmask 64512   ;;  %v30_v11 = vld [vmem:[%s2407_s0 + $0x8] sm:$0xff] }
  0x14   :  { %1880 = vset.pattern.permute.xlu0 %v1932_v1  ;;  %v61_v9 = vld [vmem:[%s2409_s2] sm:$0xff]  ;;  %v1933_v12 = vmov 0.0   ;;  %v2012_v25 = vld [vmem:[#allocation2 + $0x10] sm:$0xff]  ;;  %v2014_v26 = vld [vmem:[#allocation2 + $0x18] sm:$0xff]  ;;  %s1935_s0 = smov [#allocation5]  }
  0x15   :  { %v1971_v2 = vand.u32 127, %v31_v0  ;;  %v63_v3 = vshrl.u32 %v31_v0, 7  ;;  %34 = vperm.xlu0 %1880, %v29_v8   ;;  %v1980_v10 = vand.u32 4294901760, %v61_v9  ;;  %v2010_v24 = vld [vmem:[#allocation2] sm:$0xff]  ;;  %v2017_v29 = vld [vmem:[#allocation2 + $0x8] sm:$0xff]  ;;  %v581_v35 = vand.u32 4294901760, %v2012_v25 }
  0x16   :  { %v2019_v30 = vld [vmem:[#allocation2 + $0x20] sm:$0xff]  ;;  %v2021_v31 = vld [vmem:[#allocation2 + $0x28] sm:$0xff]  ;;  %v575_v34 = vand.u32 4294901760, %v2010_v24  ;;  %v584_v36 = vand.u32 4294901760, %v2014_v26  ;;  %v578_v38 = vand.u32 4294901760, %v2017_v29  ;;  %v2033_v41 = vld [vmem:[#allocation2 + $0x30] sm:$0xff] }
  0x17   :  { %v64_v4 = vadd.s32 8, %v63_v3  ;;  %v65_v5 = vmul.u32 2, %v1971_v2  ;;  %1419 = vmatprep.subr.mxu1 %v1980_v10  ;;  %1434 = vmatprep.subr.mxu0 %v1980_v10  ;;  %v1991_v14 = vsub.f32 %v61_v9, %v1980_v10  ;;  %v587_v39 = vand.u32 4294901760, %v2019_v30  ;;  %v2045_v44 = vld [vmem:[#allocation2 + $0x38] sm:$0xff]  ;;  %v2059_v47 = vld [vmem:[#allocation2 + $0x40] sm:$0xff]  ;;  %v2074_v55 = vld [vmem:[#allocation2 + $0x48] sm:$0xff] }
  0x18   :  { %1420 = vmatpush3.msra.mxu1 %v1980_v10  ;;  %1435 = vmatpush3.msra.mxu0 %v1980_v10  ;;  %v590_v40 = vand.u32 4294901760, %v2021_v31  ;;  %v2038_v42 = vsub.f32 %v2012_v25, %v581_v35  ;;  %v2043_v43 = vsub.f32 %v2014_v26, %v584_v36  ;;  %v2068_v50 = vpack.c.bf16 %v578_v38, %v575_v34  ;;  %v2090_v63 = vld [vmem:[#allocation2 + $0x50] sm:$0xff]  ;;  %v2104_v8 = vld [vmem:[#allocation2 + $0x58] sm:$0xff]  ;;  %s1265_s2 = sshll.u32 %s1935_s0, 4  ;;  %s1266_s2 = int_to_ptr.vmem [resolvable:$true] %s1265_s2 }
  0x19   :  { %v66_v6 = vsub.s32 %v63_v3, %v65_v5  ;;  %v67_v7 = vsub.s32 %v64_v4, %v65_v5  ;;  %37 = vperm.xlu0 %1880, %v30_v11   ;;  %v174_v19 = vand.u32 4294901760, %v1991_v14  ;;  %v2050_v45 = vsub.f32 %v2019_v30, %v587_v39  ;;  %s1903_s4 = scalar_lea.vmem %s1266_s2, 256  ;;  %p1908_p9 = scmp.lt.s32.totalorder %s1266_s2, %s1266_s2 }
  0x1a   :  { %v2055_v46 = vsub.f32 %v2021_v31, %v590_v40  ;;  %v692_v48 = vand.u32 4294901760, %v2038_v42  ;;  %v699_v49 = vand.u32 4294901760, %v2043_v43  ;;  %v593_v51 = vand.u32 4294901760, %v2033_v41  ;;  %p1904_p8 = scmp.ne.s32.totalorder %s1266_s2, %s1903_s4  ;;  %p1909_p10 = scmp.lt.s32.totalorder %s1903_s4, %s1903_s4 }
  0x1b   :  { %vm68_vm1 = vcmp.ge.s32.totalorder %v66_v6, 0  ;;  %vm70_vm2 = vcmp.lt.s32.totalorder %v66_v6, 2  ;;  %vm69_vm3 = vcmp.ge.s32.totalorder %v67_v7, 0  ;;  %vm71_vm5 = vcmp.lt.s32.totalorder %v67_v7, 2  ;;  %1439 = vmatprep.subr.mxu0 %v174_v19 }
  0x1c   :  { %vm72_vm4 = vmand %vm68_vm1, %vm70_vm2  ;;  %v175_v22 = vsub.f32 %v1991_v14, %v174_v19  ;;  %v706_v52 = vand.u32 4294901760, %v2050_v45  ;;  %v713_v53 = vand.u32 4294901760, %v2055_v46  ;;  %v596_v54 = vand.u32 4294901760, %v2045_v44  ;;  %p1910_p11 = por %p1909_p10, %p1908_p9 }
  0x1d   :  { %v1988_v13 = vsel %vm72_vm4, 1.0, %v1933_v12  ;;  %vm73_vm6 = vmand %vm69_vm3, %vm71_vm5  ;;  %v2076_v56 = vpack.c.bf16 %v699_v49, %v692_v48  ;;  %v693_v57 = vsub.f32 %v2038_v42, %v692_v48  ;;  %v700_v58 = vsub.f32 %v2043_v43, %v699_v49 }
  0x1e   :  { %v80_v15 = vsel %vm78_vm0, %v1988_v13, 0  ;;  %v1998_v16 = vsel %vm73_vm6, 1.0, %v1933_v12  ;;  %v176_v28 = vand.u32 4294901760, %v175_v22  ;;  %v599_v59 = vand.u32 4294901760, %v2059_v47  ;;  %p1911_p12 = pnand %p1910_p11, %p1904_p8 }
  0x1f   :  { %v2000_v17 = vsub.f32 %v80_v15, %v80_v15  ;;  %v83_v18 = vsel %vm78_vm0, %v1998_v16, 0  ;;  %v2083_v60 = vpack.c.bf16 %v713_v53, %v706_v52  ;;  %v707_v61 = vsub.f32 %v2050_v45, %v706_v52 }
  0x20   :  { %v2005_v20 = vsub.f32 %v83_v18, %v83_v18  ;;  %1424 = vmatprep.subr.mxu1 %v176_v28  ;;  %v714_v62 = vsub.f32 %v2055_v46, %v713_v53  ;;  %v694_v0 = vand.u32 4294901760, %v693_v57  ;;  %v701_v1 = vand.u32 4294901760, %v700_v58 }
  0x21   :  { %v153_v21 = vand.u32 4294901760, %v2000_v17  ;;  %v2095_v3 = vsub.f32 %v2033_v41, %v593_v51  ;;  %v2100_v4 = vsub.f32 %v2045_v44, %v596_v54  ;;  %v602_v5 = vand.u32 4294901760, %v2074_v55 }
  0x22   :  { %v163_v23 = vand.u32 4294901760, %v2005_v20  ;;  %v708_v6 = vand.u32 4294901760, %v707_v61  ;;  %v715_v7 = vand.u32 4294901760, %v714_v62  ;;  %v2106_v9 = vpack.c.bf16 %v701_v1, %v694_v0  ;;  %v2174_v62 = vld [vmem:[#allocation2 + $0x70] sm:$0xff] }
  0x23   :  { %v154_v27 = vsub.f32 %v2000_v17, %v153_v21  ;;  %1436 = vmatprep.mubr.f32.mxu0 %v153_v21  ;;  %v727_v11 = vand.u32 4294901760, %v2100_v4  ;;  %v605_v15 = vand.u32 4294901760, %v2090_v63  ;;  %v2127_v21 = vld [vmem:[#allocation2 + $0x60] sm:$0xff]  ;;  %v2172_v61 = vpack.c.bf16 %v590_v40, %v587_v39 }
  0x24   :  { %v164_v32 = vsub.f32 %v2005_v20, %v163_v23  ;;  %1437 = vmatmul.mubr.f32.vlgmr.msra.gmra.mrb[0].mxu0 %v163_v23  ;;  %v2118_v18 = vpack.c.bf16 %v715_v7, %v708_v6  ;;  %v611_v25 = vand.u32 4294901760, %v2127_v21  ;;  %v60_v6 = vld [vmem:[#allocation2 + $0x78] sm:$0xff]  ;;  %v617_v40 = vand.u32 4294901760, %v2174_v62 }
  0x25   :  { %v155_v33 = vand.u32 4294901760, %v154_v27  ;;  %1440 = vmatpush3.msra.mxu0 %v174_v19  ;;  %1441 = vmatprep.mubr.msk.f32.mxu0 %vm78_vm0, %v1988_v13  ;;  %v2123_v19 = vsub.f32 %v2074_v55, %v602_v5  ;;  %v728_v27 = vsub.f32 %v2100_v4, %v727_v11  ;;  %v2149_v52 = vsub.f32 %v2090_v63, %v605_v15 }
  0x26   :  { %v165_v37 = vand.u32 4294901760, %v164_v32  ;;  %1444 = vmatprep.subr.mxu0 %v1980_v10  ;;  %v2139_v32 = vpack.c.bf16 %v584_v36, %v581_v35  ;;  %v677_v55 = vsub.f32 %v2010_v24, %v575_v34 }
  0x27   :  { %1421 = vmatprep.mubr.f32.mxu1 %v155_v33  ;;  %v741_v33 = vand.u32 4294901760, %v2123_v19  ;;  %v729_v48 = vand.u32 4294901760, %v728_v27 }
  0x28   :  { %1422 = vmatmul.mubr.f32.vlgmr.msra.gmra.mrb[0].mxu1 %v165_v37  ;;  %v678_v24 = vand.u32 4294901760, %v677_v55 }
  0x29   :  { %1425 = vmatpush3.msra.mxu1 %v176_v28  ;;  %1426 = vmatprep.mubr.msk.f32.mxu1 %vm78_vm0, %v1988_v13  ;;  %v742_v35 = vsub.f32 %v2123_v19, %v741_v33 }
  0x2a   :  { %1429 = vmatprep.subr.mxu1 %v1991_v14 }
  0x2b   :  { %v743_v0 = vand.u32 4294901760, %v742_v35  ;;  %v775_v35 = vsub.f32 %v2174_v62, %v617_v40 }
  0x2c   :  { %1442 = vmatmul.mubr.msk.f32.vlgmr.msra.gmra.mrb[0].mxu0 %vm78_vm0, %v1998_v16 }
  0x2d   :  { %1445 = vmatpush3.msra.mxu0 %v1980_v10  ;;  %1446 = vmatprep.mubr.msk.f32.mxu0 %vm78_vm0, %v1988_v13  ;;  %v720_v10 = vand.u32 4294901760, %v2095_v3  ;;  %v2113_v13 = vsub.f32 %v2059_v47, %v599_v59 }
  0x2e   :  { %1756 = vmatprep.subr.bf16.mxu0 %v2068_v50 }
  0x2f   :  { %v2129_v22 = vpack.c.bf16 %v727_v11, %v720_v10  ;;  %v721_v23 = vsub.f32 %v2095_v3, %v720_v10  ;;  %v734_v28 = vand.u32 4294901760, %v2113_v13  ;;  %v2181_v10 = vsub.f32 %v2127_v21, %v611_v25 }
  0x30   :  { %1427 = vmatmul.mubr.msk.f32.vlgmr.msra.gmra.mrb[0].mxu1 %vm78_vm0, %v1998_v16  ;;  %v2262_v21 = vpack.c.bf16 %v2043_v43, %v2038_v42  ;;  %v2277_v43 = vpack.c.bf16 %v2100_v4, %v2095_v3 }
  0x31   :  { %1430 = vmatpush3.msra.mxu1 %v1991_v14  ;;  %1431 = vmatprep.mubr.f32.mxu1 %v2000_v17  ;;  %v608_v14 = vand.u32 4294901760, %v2104_v8  ;;  %v2142_v17 = vld [vmem:[#allocation2 + $0x68] sm:$0xff]  ;;  %v722_v37 = vand.u32 4294901760, %v721_v23  ;;  %v735_v49 = vsub.f32 %v2113_v13, %v734_v28  ;;  %v2154_v26 = vpack.c.bf16 %v741_v33, %v734_v28 }
  0x32   :  { %1660 = vmatprep.subr.bf16.mxu1 %v2068_v50  ;;  %v614_v53 = vand.u32 4294901760, %v2142_v17  ;;  %v762_v27 = vand.u32 4294901760, %v2181_v10 }
  0x33   :  { %v2160_v36 = vsub.f32 %v2104_v8, %v608_v14  ;;  %v2164_v57 = vpack.c.bf16 %v729_v48, %v722_v37  ;;  %v736_v58 = vand.u32 4294901760, %v735_v49  ;;  %v2234_v47 = vpack.c.bf16 %v608_v14, %v605_v15 }
  0x34   :  { %1447 = vmatmul.mubr.msk.f32.vlgmr.msra.gmra.mrb[0].mxu0 %vm78_vm0, %v1998_v16  ;;  %v748_v16 = vand.u32 4294901760, %v2149_v52  ;;  %v2184_v11 = vsub.f32 %v2142_v17, %v614_v53  ;;  %v620_v17 = vand.u32 4294901760, %v60_v6  ;;  %v763_v48 = vsub.f32 %v2181_v10, %v762_v27 }
  0x35   :  { %1758 = vmatpush3.bf16.msra.mxu0 %v2068_v50  ;;  %v755_v1 = vand.u32 4294901760, %v2160_v36  ;;  %v2187_v30 = vpack.c.bf16 %v743_v0, %v736_v58  ;;  %v2250_v63 = vpack.c.bf16 %v614_v53, %v611_v25 }
  0x36   :  { %1760 = vmatprep.subr.bf16.mxu0 %v2139_v32  ;;  %v749_v7 = vsub.f32 %v2149_v52, %v748_v16  ;;  %v769_v28 = vand.u32 4294901760, %v2184_v11  ;;  %v764_v41 = vand.u32 4294901760, %v763_v48 }
  0x37   :  { %v2189_v31 = vpack.c.bf16 %v755_v1, %v748_v16  ;;  %v756_v39 = vsub.f32 %v2160_v36, %v755_v1  ;;  %v782_v16 = vsub.f32 %v60_v6, %v620_v17 }
  0x38   :  { %1432 = vmatmul.mubr.f32.vlgmr.msra.gmra.mrb[0].mxu1 %v2005_v20  ;;  %v750_v23 = vand.u32 4294901760, %v749_v7  ;;  %v2203_v20 = vpack.c.bf16 %v596_v54, %v593_v51  ;;  %v2205_v37 = vpack.c.bf16 %v769_v28, %v762_v27  ;;  %v770_v49 = vsub.f32 %v2184_v11, %v769_v28 }
  0x39   :  { %1662 = vmatpush3.bf16.msra.mxu1 %v2068_v50  ;;  %1762 = vmatpush3.bf16.msra.mxu0 %v2139_v32  ;;  %v757_v33 = vand.u32 4294901760, %v756_v39  ;;  %v776_v51 = vand.u32 4294901760, %v775_v35  ;;  %v2220_v54 = vpack.c.bf16 %v602_v5, %v599_v59  ;;  %v783_v62 = vand.u32 4294901760, %v782_v16 }
  0x3a   :  { %1664 = vmatprep.subr.bf16.mxu1 %v2139_v32  ;;  %1764 = vmatprep.subr.bf16.mxu0 %v2172_v61  ;;  %v771_v44 = vand.u32 4294901760, %v770_v49  ;;  %v684_v59 = vsub.f32 %v2017_v29, %v578_v38  ;;  %v2258_v29 = vpack.c.bf16 %v620_v17, %v617_v40  ;;  %v679_v38 = vsub.f32 %v677_v55, %v678_v24 }
  0x3b   :  { %v2210_v58 = vpack.c.bf16 %v757_v33, %v750_v23  ;;  %v777_v1 = vsub.f32 %v775_v35, %v776_v51  ;;  %v2224_v6 = vpack.c.bf16 %v783_v62, %v776_v51  ;;  %v784_v7 = vsub.f32 %v782_v16, %v783_v62 }
  0x3c   :  { %v2222_v0 = vpack.c.bf16 %v771_v44, %v764_v41  ;;  %v685_v34 = vand.u32 4294901760, %v684_v59  ;;  %v2252_v8 = vpack.c.bf16 %v684_v59, %v677_v55  ;;  %v680_v25 = vand.u32 4294901760, %v679_v38 }
  0x3d   :  { %1666 = vmatpush3.bf16.msra.mxu1 %v2139_v32  ;;  %1766 = vmatpush3.bf16.msra.mxu0 %v2172_v61  ;;  %v778_v39 = vand.u32 4294901760, %v777_v1  ;;  %v785_v5 = vand.u32 4294901760, %v784_v7  ;;  %v2270_v40 = vpack.c.bf16 %v2055_v46, %v2050_v45  ;;  %v2282_v27 = vpack.c.bf16 %v2123_v19, %v2113_v13 }
  0x3e   :  { %1668 = vmatprep.subr.bf16.mxu1 %v2172_v61  ;;  %1768 = vmatprep.subr.bf16.mxu0 %v2203_v20  ;;  %v686_v15 = vsub.f32 %v684_v59, %v685_v34  ;;  %v1787_v14 = vpack.c.bf16 %v685_v34, %v678_v24  ;;  %v2286_v45 = vpack.c.bf16 %v2160_v36, %v2149_v52  ;;  %v1934_v49 = vmov 1.0  }
  0x3f   :  { %v2242_v23 = vpack.c.bf16 %v785_v5, %v778_v39  ;;  %v2290_v46 = vpack.c.bf16 %v2184_v11, %v2181_v10  ;;  %v2292_v28 = vpack.c.bf16 %v782_v16, %v775_v35 }
  0x40   :  { %v687_v53 = vand.u32 4294901760, %v686_v15 }
  0x41   :  { %1670 = vmatpush3.bf16.msra.mxu1 %v2172_v61  ;;  %1770 = vmatpush3.bf16.msra.mxu0 %v2203_v20 }
  0x42   :  { %1672 = vmatprep.subr.bf16.mxu1 %v2203_v20  ;;  %1772 = vmatprep.subr.bf16.mxu0 %v2220_v54  ;;  %v1691_v42 = vpack.c.bf16 %v687_v53, %v680_v25 }
  0x45   :  { %1674 = vmatpush3.bf16.msra.mxu1 %v2203_v20  ;;  %1774 = vmatpush3.bf16.msra.mxu0 %v2220_v54 }
  0x46   :  { %1676 = vmatprep.subr.bf16.mxu1 %v2220_v54  ;;  %1776 = vmatprep.subr.bf16.mxu0 %v2234_v47 }
  0x49   :  { %1678 = vmatpush3.bf16.msra.mxu1 %v2220_v54  ;;  %1778 = vmatpush3.bf16.msra.mxu0 %v2234_v47 }
  0x4a   :  { %1680 = vmatprep.subr.bf16.mxu1 %v2234_v47  ;;  %1780 = vmatprep.subr.bf16.mxu0 %v2250_v63 }
  0x4d   :  { %1682 = vmatpush3.bf16.msra.mxu1 %v2234_v47  ;;  %1782 = vmatpush3.bf16.msra.mxu0 %v2250_v63 }
  0x4e   :  { %1684 = vmatprep.subr.bf16.mxu1 %v2250_v63  ;;  %1784 = vmatprep.subr.bf16.mxu0 %v2258_v29 }
  0x51   :  { %1686 = vmatpush3.bf16.msra.mxu1 %v2250_v63  ;;  %1786 = vmatpush3.bf16.msra.mxu0 %v2258_v29 }
  0x52   :  { %1688 = vmatprep.subr.bf16.mxu1 %v2258_v29  ;;  %1788 = vmatprep.subr.bf16.mxu0 %v1787_v14 }
  0x55   :  { %1690 = vmatpush3.bf16.msra.mxu1 %v2258_v29 }
  0x56   :  { %1692 = vmatprep.subr.bf16.mxu1 %v1691_v42 }
  0x94   :  { %v35_v17 = vpop.permute.xlu0 %34 }
  0x95   :  { %vm39_vm7 = vcmp.eq.s32.totalorder %v1971_v2, %v35_v17 }
  0x96   :  { %v1277_v3 = vsel %vm39_vm7, 1.0, %v1933_v12 }
  0x97   :  { %v656_v4 = vsub.f32 %v1277_v3, %v1277_v3 }
  0x98   :  { %v2298_v13 = vpop.permute.xlu0 %37 }
  0x99   :  { %vm40_vm8 = vcmp.eq.s32.totalorder %v1971_v2, %v2298_v13  ;;  %v657_v19 = vand.u32 4294901760, %v656_v4 }
  0x9a   :  { %v1278_v52 = vsel %vm40_vm8, 1.0, %v1933_v12 }
  0x9b   :  { %v2306_v36 = vsub.f32 %v1278_v52, %v1278_v52  ;;  %1586 = vmatprep.mubr.f32.mxu0 %v657_v19  ;;  %v658_v10 = vsub.f32 %v656_v4, %v657_v19 }
  0x9d   :  { %v659_v11 = vand.u32 4294901760, %v658_v10  ;;  %v667_v33 = vand.u32 4294901760, %v2306_v36 }
  0x9f   :  { %1481 = vmatprep.mubr.f32.mxu1 %v659_v11  ;;  %1587 = vmatmul.mubr.f32.vlgmr.msra.gmra.mrb[2].mxu0 %v667_v33  ;;  %v668_v48 = vsub.f32 %v2306_v36, %v667_v33 }
  0xa0   :  { %1790 = vmatpush3.bf16.msra.mxu0 %v1787_v14  ;;  %1621 = vmatprep.mubr.msk.f32.mxu0 %vm39_vm7, %v1934_v49 }
  0xa1   :  { %1792 = vmatprep.subr.bf16.mxu0 %v2076_v56  ;;  %v669_v12 = vand.u32 4294901760, %v668_v48 }
  0xa3   :  { %1482 = vmatmul.mubr.f32.vlgmr.msra.gmra.mrb[2].mxu1 %v669_v12 }
  0xa4   :  { %1694 = vmatpush3.bf16.msra.mxu1 %v1691_v42  ;;  %1794 = vmatpush3.bf16.msra.mxu0 %v2076_v56 }
  0xa5   :  { %1516 = vmatprep.mubr.msk.f32.mxu1 %vm39_vm7, %v1934_v49  ;;  %1696 = vmatprep.subr.bf16.mxu1 %v2106_v9 }
  0xa6   :  { %1796 = vmatprep.subr.bf16.mxu0 %v2083_v60 }
  0xa8   :  { %1698 = vmatpush3.bf16.msra.mxu1 %v2106_v9  ;;  %1798 = vmatpush3.bf16.msra.mxu0 %v2083_v60 }
  0xa9   :  { %1700 = vmatprep.subr.bf16.mxu1 %v2118_v18  ;;  %1800 = vmatprep.subr.bf16.mxu0 %v2129_v22 }
  0xac   :  { %1702 = vmatpush3.bf16.msra.mxu1 %v2118_v18  ;;  %1802 = vmatpush3.bf16.msra.mxu0 %v2129_v22 }
  0xad   :  { %1704 = vmatprep.subr.bf16.mxu1 %v2164_v57  ;;  %1804 = vmatprep.subr.bf16.mxu0 %v2154_v26 }
  0xb0   :  { %1706 = vmatpush3.bf16.msra.mxu1 %v2164_v57  ;;  %1806 = vmatpush3.bf16.msra.mxu0 %v2154_v26 }
  0xb1   :  { %1708 = vmatprep.subr.bf16.mxu1 %v2187_v30  ;;  %1808 = vmatprep.subr.bf16.mxu0 %v2189_v31 }
  0xb4   :  { %1710 = vmatpush3.bf16.msra.mxu1 %v2187_v30  ;;  %1810 = vmatpush3.bf16.msra.mxu0 %v2189_v31 }
  0xb5   :  { %1712 = vmatprep.subr.bf16.mxu1 %v2210_v58  ;;  %1812 = vmatprep.subr.bf16.mxu0 %v2205_v37 }
  0xb8   :  { %1714 = vmatpush3.bf16.msra.mxu1 %v2210_v58  ;;  %1814 = vmatpush3.bf16.msra.mxu0 %v2205_v37 }
  0xb9   :  { %1716 = vmatprep.subr.bf16.mxu1 %v2222_v0  ;;  %1816 = vmatprep.subr.bf16.mxu0 %v2224_v6 }
  0xbc   :  { %1718 = vmatpush3.bf16.msra.mxu1 %v2222_v0  ;;  %1818 = vmatpush3.bf16.msra.mxu0 %v2224_v6 }
  0xbd   :  { %1720 = vmatprep.subr.bf16.mxu1 %v2242_v23  ;;  %1820 = vmatprep.subr.bf16.mxu0 %v2068_v50 }
  0xbf   :  { %1622 = vmatmul.mubr.msk.f32.vlgmr.msra.gmra.mrb[2].mxu0 %vm40_vm8, %v1934_v49 }
  0xc0   :  { %1722 = vmatpush3.bf16.msra.mxu1 %v2242_v23  ;;  %1822 = vmatpush3.bf16.msra.mxu0 %v2068_v50 }
  0xc1   :  { %1656 = vmatprep.mubr.msk.f32.mxu0 %vm39_vm7, %v1934_v49  ;;  %1724 = vmatprep.subr.bf16.mxu1 %v2252_v8 }
  0xc2   :  { %1824 = vmatprep.subr.bf16.mxu0 %v2139_v32 }
  0xc3   :  { %1517 = vmatmul.mubr.msk.f32.vlgmr.msra.gmra.mrb[2].mxu1 %vm40_vm8, %v1934_v49 }
  0xc4   :  { %1726 = vmatpush3.bf16.msra.mxu1 %v2252_v8  ;;  %1551 = vmatprep.mubr.f32.mxu1 %v656_v4 }
  0xc5   :  { %1826 = vmatpush3.bf16.msra.mxu0 %v2139_v32  ;;  %1728 = vmatprep.subr.bf16.mxu1 %v2262_v21 }
  0xc6   :  { %1828 = vmatprep.subr.bf16.mxu0 %v2172_v61 }
  0xc8   :  { %1730 = vmatpush3.bf16.msra.mxu1 %v2262_v21 }
  0xc9   :  { %1830 = vmatpush3.bf16.msra.mxu0 %v2172_v61  ;;  %1732 = vmatprep.subr.bf16.mxu1 %v2270_v40 }
  0xca   :  { %1832 = vmatprep.subr.bf16.mxu0 %v2203_v20 }
  0xcc   :  { %1734 = vmatpush3.bf16.msra.mxu1 %v2270_v40 }
  0xcd   :  { %1834 = vmatpush3.bf16.msra.mxu0 %v2203_v20  ;;  %1736 = vmatprep.subr.bf16.mxu1 %v2277_v43 }
  0xce   :  { %1836 = vmatprep.subr.bf16.mxu0 %v2220_v54 }
  0xd0   :  { %1738 = vmatpush3.bf16.msra.mxu1 %v2277_v43 }
  0xd1   :  { %1838 = vmatpush3.bf16.msra.mxu0 %v2220_v54  ;;  %1740 = vmatprep.subr.bf16.mxu1 %v2282_v27 }
  0xd2   :  { %1840 = vmatprep.subr.bf16.mxu0 %v2234_v47 }
  0xd4   :  { %1742 = vmatpush3.bf16.msra.mxu1 %v2282_v27 }
  0xd5   :  { %1842 = vmatpush3.bf16.msra.mxu0 %v2234_v47  ;;  %1744 = vmatprep.subr.bf16.mxu1 %v2286_v45 }
  0xd6   :  { %1844 = vmatprep.subr.bf16.mxu0 %v2250_v63 }
  0xd8   :  { %1746 = vmatpush3.bf16.msra.mxu1 %v2286_v45 }
  0xd9   :  { %1846 = vmatpush3.bf16.msra.mxu0 %v2250_v63  ;;  %1748 = vmatprep.subr.bf16.mxu1 %v2290_v46 }
  0xda   :  { %1848 = vmatprep.subr.bf16.mxu0 %v2258_v29 }
  0xdc   :  { %1750 = vmatpush3.bf16.msra.mxu1 %v2290_v46 }
  0xdd   :  { %1850 = vmatpush3.bf16.msra.mxu0 %v2258_v29  ;;  %1752 = vmatprep.subr.bf16.mxu1 %v2292_v28 }
  0xe0   :  { %1657 = vmatmul.mubr.msk.f32.vlgmr.msra.gmra.mrb[2].mxu0 %vm40_vm8, %v1934_v49  ;;  %1754 = vmatpush3.bf16.msra.mxu1 %v2292_v28 }
  0xe3   :  { %1552 = vmatmul.mubr.f32.vlgmr.msra.gmra.mrb[2].mxu1 %v2306_v36 }
 0x107   :  { %v1448_v50 = vpop.f32.mrb[0].mxu0 }
 0x108   :  { %v564_v56 = vpop.f32.mrb[1].mxu0 }
 0x10b   :  { %v1433_v60 = vpop.f32.mrb[0].mxu1 }
 0x10c   :  { %v1851_v9 = vadd.f32 %v1448_v50, %v1433_v60  ;;  %v323_v18 = vpop.f32.mrb[1].mxu1 }
 0x10d   :  { %v1854_v22 = vadd.f32 %v564_v56, %v323_v18 }
 0x1b3   :  { %v1658_v32 = vpop.f32.mrb[2].mxu0 }
 0x1b4   :  { %v1248_v26 = vpop.f32.mrb[3].mxu0 }
 0x1b6   :  { %v1553_v57 = vpop.f32.mrb[2].mxu1 }
 0x1b7   :  { %v1852_v61 = vadd.f32 %v1851_v9, %v1553_v57  ;;  %v932_v30 = vpop.f32.mrb[3].mxu1 }
 0x1b8   :  { %v1855_v31 = vadd.f32 %v1854_v22, %v932_v30 }
 0x1b9   :  { %v1853_v2 = vadd.f32 %v1852_v61, %v1658_v32 }
 0x1ba   :  { %v1856_v20 = vadd.f32 %v1855_v31, %v1248_v26 }
 0x1bb   :  { %1259 = vst [vmem:[#allocation5 + $0x8] sm:$0xff] %v1853_v2 }
 0x1bc   :  { %1258 = vst [vmem:[#allocation5] sm:$0xff] %v1856_v20 }
 0x1bd   :  { %1914 = shalt.err (!%p1911_p12)
}
 0x1be   :  { %s1915_s7 = scalar_lea.hbm %s2410_s3, 256 }
 0x1bf   :  { %p1916_p13 = scmp.ne.s32.totalorder %s2410_s3, %s1915_s7  ;;  %p1919_p0 = scmp.lt.u32.totalorder %s1915_s7, %s2410_s3 }
 0x1c1   :  { %p1921_p1 = pnand %p1919_p0, %p1916_p13 }
 0x1c3   :  { %1924 = shalt.err (!%p1921_p1)
}
 0x1c4   :  { %1271 = dma.vmem_to_hbm [thread:$0]  %s1266_s2, 256, %s2410_s3, [#allocation4], %s1930_s22, %s1930_s22, %s1931_s23  }
 0x1c5   :  { %1927 = dma.done.wait [#allocation4], 256  }
 0x1c6   :  { %1928 = vsyncadd [#allocation4], 4294967040 }
 0x1c7   :  { %1275 = vsyncpa [#allocation3], 1 }
 0x1c8   :  { %1276 = vsyncpa [#allocation4], 1 }

</bundles_post_ra>
